<compile_context>
chip_gen: v5e
topology: v5e:2x2
jax: 0.10.0
libtpu: 0.0.40
codegen_flags: <defaults>
</compile_context>

<pallas_src>
import functools
import math

import jax
import jax.numpy as jnp
from jax.experimental import pallas as pl
from jax.experimental.pallas import tpu as pltpu


_TARGET_BLOCK_BYTES = 4 << 20    # ~4 MiB payload per block
_VMEM_BUDGET_BYTES = 40 << 20    # what blocks are sized against (headroom)
_VMEM_LIMIT_BYTES = 48 << 20     # <= v7x 64 MiB/TC; ample on v5e/v6e


def _cdiv(a: int, b: int) -> int:
    return -(-a // b)


def _round_up(v: int, m: int) -> int:
    return _cdiv(v, m) * m


def _sublane_pack(itemsize: int) -> int:
    # Rows per 32-bit sublane slot: 8 for f32, 16 for bf16, 32 for int8.
    return max(8, 32 // max(1, itemsize))


def _taylor_series_horner(x, n: int):
    """1 + x*(1 + x/2*(1 + x/3*(... (1 + x/n)))) == sum_{i=0..n} x^i / i!."""
    if n <= 0:
        return jnp.ones_like(x)
    fn = 1.0 + x * (1.0 / float(n))
    for i in range(n - 1, 0, -1):
        fn = 1.0 + (x * (1.0 / float(i))) * fn
    return fn


def _normalize(fn, s):
    # Approx reciprocal (EUP slot) + 2 Newton steps on the tiny reduced slab.
    inv = pl.reciprocal(s, approx=True)
    inv = inv * (2.0 - s * inv)
    inv = inv * (2.0 - s * inv)
    return fn * inv


def _taylor_softmax_sublane_kernel(x_ref, o_ref, *, n: int):
    # x_ref / o_ref: (TB, C, TILE_L).  Reduce over C (axis=-2); lanes stay
    # independent, so garbage lanes in a ragged edge block never leak.
    x = x_ref[...].astype(jnp.float32)
    fn = _taylor_series_horner(x, n)
    s = jnp.sum(fn, axis=-2, keepdims=True)          # (TB, 1, TILE_L)
    o_ref[...] = _normalize(fn, s).astype(o_ref.dtype)


def _taylor_softmax_lane_kernel(x_ref, o_ref, *, n: int):
    # x_ref / o_ref: (TB, C).  Reduce over C (lanes); rows stay independent.
    x = x_ref[...].astype(jnp.float32)
    fn = _taylor_series_horner(x, n)
    s = jnp.sum(fn, axis=-1, keepdims=True)          # (TB, 1)
    o_ref[...] = _normalize(fn, s).astype(o_ref.dtype)


def _block_vmem_bytes(tb: int, c: int, tile_l: int, itemsize: int) -> int:
    """Estimated resident VMEM for one (tb, c, tile_l) block."""
    c_io = _round_up(c, _sublane_pack(itemsize))     # sublane packing of io dtype
    c_f32 = _round_up(c, 8)
    io = 2 * 2 * tb * c_io * tile_l * itemsize       # double-buffered in + out
    tmp = 3 * tb * c_f32 * tile_l * 4                # f32 intermediates
    return io + tmp


def _choose_tiles_sublane(B: int, C: int, L: int, itemsize: int):
    """Pick (tb, tile_l) for the (B, C, L) layout (reduction on sublanes)."""
    if L < 128:
        tile_l = L                                    # full-extent block is legal
    else:
        # Largest multiple of 128 (<= L) targeting ~TARGET payload, shrunk
        # until the VMEM footprint fits — no "must divide L" requirement.
        max_lanes = max(128, (_TARGET_BLOCK_BYTES // max(1, C * itemsize)) // 128 * 128)
        tile_l = max(128, min((L // 128) * 128, max_lanes))
        while tile_l > 128 and _block_vmem_bytes(1, C, tile_l, itemsize) > _VMEM_BUDGET_BYTES:
            tile_l -= 128
        # Keep >=2 grid steps when possible so both v7x TensorCores get work.
        if B == 1:
            while tile_l > 128 and _cdiv(L, tile_l) < 2:
                tile_l = max(128, _round_up(tile_l // 2, 128))

    n_l = _cdiv(L, tile_l)

    # Pack several B rows per block when the per-row slab is small, keeping
    # at least 2 grid steps for the v7x megacore.
    tb = 1
    while (tb * 2 <= B
           and tb * C * tile_l * itemsize < _TARGET_BLOCK_BYTES
           and _block_vmem_bytes(tb * 2, C, tile_l, itemsize) <= _VMEM_BUDGET_BYTES
           and _cdiv(B, tb * 2) * n_l >= 2):
        tb *= 2
    return tb, tile_l


def _choose_tile_lane(B: int, C: int, itemsize: int) -> int:
    """Pick tb for the (B, C) layout (reduction on lanes, dim == last axis)."""
    pack = _sublane_pack(itemsize)
    if B <= pack:
        return B                                      # single full-extent block
    c_lane = _round_up(C, 128)
    row_bytes = max(1, C * itemsize)
    tb = max(pack, (_TARGET_BLOCK_BYTES // row_bytes) // pack * pack)
    while tb > pack and (4 * tb * c_lane * itemsize + 3 * tb * c_lane * 4) > _VMEM_BUDGET_BYTES:
        tb -= pack
    # Keep >=2 grid steps so the single grid axis shards across v7x cores.
    tb = min(tb, _round_up(_cdiv(B, 2), pack))
    return tb


def _taylor_softmax_sublanes(x3d: jax.Array, n: int) -> jax.Array:
    B, C, L = x3d.shape
    itemsize = jnp.dtype(x3d.dtype).itemsize
    tb, tile_l = _choose_tiles_sublane(B, C, L, itemsize)
    grid = (pl.cdiv(B, tb), pl.cdiv(L, tile_l))
    cost = pl.CostEstimate(
        flops=(2 * n + 3) * B * C * L,
        transcendentals=0,
        bytes_accessed=2 * B * C * L * itemsize,
    )
    return pl.pallas_call(
        functools.partial(_taylor_softmax_sublane_kernel, n=n),
        out_shape=jax.ShapeDtypeStruct((B, C, L), x3d.dtype),
        grid_spec=pltpu.PrefetchScalarGridSpec(
            num_scalar_prefetch=0,
            grid=grid,
            in_specs=[pl.BlockSpec((tb, C, tile_l), lambda b, j: (b, 0, j))],
            out_specs=pl.BlockSpec((tb, C, tile_l), lambda b, j: (b, 0, j)),
        ),
        compiler_params=pltpu.CompilerParams(
            dimension_semantics=("parallel", "parallel"),
            vmem_limit_bytes=_VMEM_LIMIT_BYTES,
        ),
        cost_estimate=cost,
    )(x3d)


def _taylor_softmax_lanes(x2d: jax.Array, n: int) -> jax.Array:
    B, C = x2d.shape
    itemsize = jnp.dtype(x2d.dtype).itemsize
    tb = _choose_tile_lane(B, C, itemsize)
    grid = (pl.cdiv(B, tb),)
    cost = pl.CostEstimate(
        flops=(2 * n + 3) * B * C,
        transcendentals=0,
        bytes_accessed=2 * B * C * itemsize,
    )
    return pl.pallas_call(
        functools.partial(_taylor_softmax_lane_kernel, n=n),
        out_shape=jax.ShapeDtypeStruct((B, C), x2d.dtype),
        grid_spec=pltpu.PrefetchScalarGridSpec(
            num_scalar_prefetch=0,
            grid=grid,
            in_specs=[pl.BlockSpec((tb, C), lambda i: (i, 0))],
            out_specs=pl.BlockSpec((tb, C), lambda i: (i, 0)),
        ),
        compiler_params=pltpu.CompilerParams(
            dimension_semantics=("parallel",),
            vmem_limit_bytes=_VMEM_LIMIT_BYTES,
        ),
        cost_estimate=cost,
    )(x2d)


def taylor_softmax(x: jax.Array, dim: int = 1, n: int = 2) -> jax.Array:
    assert n % 2 == 0
    ndim = x.ndim
    dim = dim % ndim
    shape = x.shape

    C = shape[dim]
    B = math.prod(shape[:dim]) if dim > 0 else 1
    L = math.prod(shape[dim + 1:]) if dim < ndim - 1 else 1

    if L == 1:
        # Reduction axis is the last (contiguous) axis: reduce over lanes.
        out2d = _taylor_softmax_lanes(x.reshape(B, C), n)
        return out2d.reshape(shape)

    # TODO(synk): for 1 < L < 128 the lane axis is under-filled (L of 128
    # lanes per vreg); a gather/repack layout could recover that, but it is
    # not worth an extra HBM pass for this bandwidth-bound op.
    out3d = _taylor_softmax_sublanes(x.reshape(B, C, L), n)
    return out3d.reshape(shape)


def _taylor_softmax_ref(x, dim=1, n=2):
    x = x.astype(jnp.float32)
    fn = jnp.ones_like(x)
    denor = 1.0
    for i in range(1, n + 1):
        denor *= float(i)
        fn = fn + (x ** i) / denor
    return fn / jnp.sum(fn, axis=dim, keepdims=True)


if __name__ == "__main__":
    key = jax.random.PRNGKey(0)
    k1, k2, k3 = jax.random.split(key, 3)

    # NCHW input as the PyTorch module expects (batch=2, channels=4, 16x16).
    x = jax.random.normal(k1, (2, 4, 16, 16), dtype=jnp.float32)
    out = jax.block_until_ready(taylor_softmax(x, dim=1, n=2))
    ref = _taylor_softmax_ref(x, dim=1, n=2)
    assert out.shape == x.shape
    assert jnp.allclose(out, ref, atol=1e-5, rtol=1e-5), float(
        jnp.max(jnp.abs(out - ref)))

    # Ragged lane count (L = 180, not a multiple of 128): masked edge block,
    # no jnp.pad / slice round-trips.
    x2 = jax.random.normal(k2, (2, 4, 12, 15), dtype=jnp.float32)
    out2 = jax.block_until_ready(taylor_softmax(x2, dim=1, n=4))
    ref2 = _taylor_softmax_ref(x2, dim=1, n=4)
    assert jnp.allclose(out2, ref2, atol=1e-5, rtol=1e-5), float(
        jnp.max(jnp.abs(out2 - ref2)))

    # Reduction over the last axis -> lane-reduce variant.
    x3 = jax.random.normal(k3, (2, 3, 37), dtype=jnp.float32)
    out3 = jax.block_until_ready(taylor_softmax(x3, dim=-1, n=2))
    ref3 = _taylor_softmax_ref(x3, dim=-1, n=2)
    assert jnp.allclose(out3, ref3, atol=1e-5, rtol=1e-5), float(
        jnp.max(jnp.abs(out3 - ref3)))

    print("KERNEL_OK")
</pallas_src>

<mosaic_0001>
module attributes {stable_mosaic.version = 11 : i64} {
  func.func @_taylor_softmax_sublane_kernel(%arg0: i32, %arg1: i32, %arg2: memref<1x4x256xf32, #tpu.memory_space<vmem>>, %arg3: memref<1x4x256xf32, #tpu.memory_space<vmem>>) attributes {dimension_semantics = [#tpu.dimension_semantics<parallel>, #tpu.dimension_semantics<parallel>], iteration_bounds = array<i64: 2, 1>, scalar_prefetch = 0 : i64, scratch_operands = 0 : i64, tpu.core_type = #tpu.core_type<tc>, window_params = [{transform_indices = @transform_0, window_bounds = array<i64: 1, 4, 256>}, {transform_indices = @transform_1, window_bounds = array<i64: 1, 4, 256>}]} {
    %c0 = arith.constant 0 : index
    %c0_0 = arith.constant 0 : index
    %c0_1 = arith.constant 0 : index
    %0 = vector.load %arg2[%c0, %c0_0, %c0_1] : memref<1x4x256xf32, #tpu.memory_space<vmem>>, vector<1x4x256xf32>
    %cst = arith.constant 5.000000e-01 : f32
    %1 = vector.broadcast %cst : f32 to vector<1x4x256xf32>
    %2 = arith.mulf %0, %1 : vector<1x4x256xf32>
    %cst_2 = arith.constant 1.000000e+00 : f32
    %3 = vector.broadcast %cst_2 : f32 to vector<1x4x256xf32>
    %4 = arith.addf %3, %2 : vector<1x4x256xf32>
    %cst_3 = arith.constant 1.000000e+00 : f32
    %5 = vector.broadcast %cst_3 : f32 to vector<1x4x256xf32>
    %6 = arith.mulf %0, %5 : vector<1x4x256xf32>
    %7 = arith.mulf %6, %4 : vector<1x4x256xf32>
    %cst_4 = arith.constant 1.000000e+00 : f32
    %8 = vector.broadcast %cst_4 : f32 to vector<1x4x256xf32>
    %9 = arith.addf %8, %7 : vector<1x4x256xf32>
    %cst_5 = arith.constant dense<0.000000e+00> : vector<1x256xf32>
    %10 = vector.multi_reduction <add>, %9, %cst_5 [1] : vector<1x4x256xf32> to vector<1x256xf32>
    %11 = vector.shape_cast %10 : vector<1x256xf32> to vector<1x1x256xf32>
    %12 = tpu.reciprocal %11 {approx = true} : vector<1x1x256xf32> -> vector<1x1x256xf32>
    %13 = arith.mulf %11, %12 : vector<1x1x256xf32>
    %cst_6 = arith.constant 2.000000e+00 : f32
    %14 = vector.broadcast %cst_6 : f32 to vector<1x1x256xf32>
    %15 = arith.subf %14, %13 : vector<1x1x256xf32>
    %16 = arith.mulf %12, %15 : vector<1x1x256xf32>
    %17 = arith.mulf %11, %16 : vector<1x1x256xf32>
    %cst_7 = arith.constant 2.000000e+00 : f32
    %18 = vector.broadcast %cst_7 : f32 to vector<1x1x256xf32>
    %19 = arith.subf %18, %17 : vector<1x1x256xf32>
    %20 = arith.mulf %16, %19 : vector<1x1x256xf32>
    %21 = vector.broadcast %20 : vector<1x1x256xf32> to vector<1x4x256xf32>
    %22 = arith.mulf %9, %21 : vector<1x4x256xf32>
    %c0_8 = arith.constant 0 : index
    %c0_9 = arith.constant 0 : index
    %c0_10 = arith.constant 0 : index
    %23 = vector.load %arg3[%c0_8, %c0_9, %c0_10] : memref<1x4x256xf32, #tpu.memory_space<vmem>>, vector<1x4x256xf32>
    tpu.vector_store %arg3[%c0_8, %c0_9, %c0_10], %22 {strides = array<i32>} : memref<1x4x256xf32, #tpu.memory_space<vmem>>, vector<1x4x256xf32>,
    return
  }
  func.func @transform_0(%arg0: i32, %arg1: i32) -> (i32, i32, i32) {
    %c0_i32 = arith.constant 0 : i32
    %c0_i32_0 = arith.constant 0 : i32
    return %arg0, %c0_i32, %arg1 : i32, i32, i32
  }
  func.func @transform_1(%arg0: i32, %arg1: i32) -> (i32, i32, i32) {
    %c0_i32 = arith.constant 0 : i32
    %c0_i32_0 = arith.constant 0 : i32
    return %arg0, %c0_i32, %arg1 : i32, i32, i32
  }
}

</mosaic_0001>

<bundles_post_ra>
// kernel: tpu_custom_call.1
= control target key start
LH: loop header
LB: loop body
LE: loop exit
PB: predicated region body
PF: predicated region fallthrough
CT: control target
= control target key end

     0   :  { %6 = vsyncpa [#allocation3], 0  ;;  %s639_s0 = inlined_call_operand.hbm [shape: f32[2,4,256], index: 0, kind: input, shape index: {}]   ;;  %s640_s1 = inlined_call_operand.hbm [shape: f32[2,4,256], index: 1, kind: output, shape index: {}]  }
   0x1   :  { %8 = vsyncpa [#allocation3 + $0x1], 0 }
   0x2   :  { %9 = vsyncpa [#allocation4], 0 }
   0x3   :  { %11 = vsyncpa [#allocation4 + $0x1], 0  ;;  %s512_s6 = smov 0   ;;  %s514_s7 = smov 0  }
   0x4   :  { %s516_s8 = smov 0   ;;  %s518_s9 = smov 0  }
   0x5   :  { %s520_s10 = smov 0   ;;  %s522_s11 = smov 0  }
   0x6 LB: > { %s305_s12 = sadd.s32 4294967295, %s500_s11   ;;  %s306_s13 = sadd.s32 4294967294, %s500_s11   ;;  %s500_s11 = sphi %s522_s11, %s17_s11   ;;  %s496_s10 = sphi %s520_s10, %s649_s10   ;;  %s492_s9 = sphi %s518_s9, %s648_s9   ;;  %s488_s8 = sphi %s516_s8, %s647_s8   ;;  %s484_s7 = sphi %s514_s7, %s646_s7   ;;  %s480_s6 = sphi %s512_s6, %s645_s6  }
   0x7   : > { %s29_s14 = sadd.s32 1, %s496_s10  ;;  %s38_s15 = sadd.s32 1, %s488_s8 }
   0x8   : > { %p31_p0 = scmp.ge.s32.totalorder %s29_s14, 2  ;;  %p45_p1 = scmp.ne.s32.totalorder %s488_s8, %s484_s7 }
   0x9   : > { %p46_p2 = scmp.eq.s32.totalorder %s500_s11, 0  ;;  %p51_p3 = scmp.ne.s32.totalorder %s484_s7, %s480_s6 }
   0xa   : > { %s651_s14 = smov (%p31_p0, %s29_s14), 0  ;;  %p52_p5 = scmp.eq.s32.totalorder %s305_s12, 0 }
   0xb   : > { %p553_p4 = por %p46_p2, %p45_p1  ;;  %s33_s17 = ssub.s32 %s496_s10, %s651_s14 }
   0xc   : > { %p77_p6 = scmp.eq.s32.totalorder %s305_s12, 1  ;;  %p36_p7 = scmp.eq.s32.totalorder %s33_s17, 0 }
   0xd   : > { %p559_p8 = por %p52_p5, %p51_p3  ;;  %p83_p10 = scmp.eq.s32.totalorder %s306_s13, 1 }
   0xe   : > { %p563_p9 = por %p77_p6, %p45_p1  ;;  %p308_p12 = scmp.ge.s32.totalorder %s500_s11, 2 }
   0xf   : > { %s568_s20 = scalar_select %p36_p7, %s488_s8, %s38_s15  }
  0x10   : > { %p570_p11 = por %p83_p10, %p51_p3  ;;  %p334_p13 = scmp.lt.s32.totalorder %s500_s11, 2 }
  0x11   : > { %s103_s22 = sand.u32 1, %s488_s8   ;;  %s320_s24 = sshll.u32 %s496_s10, 3 }
  0x12   : > { %s309_s23 = sshll.u32 %s103_s22, 3  ;;  %s114_s27 = scalar_lea.hbm %s639_s0, %s320_s24 }
  0x13   : > { %s107_s28 = scalar_lea.vmem [#allocation2], %s309_s23  ;;  %s116_s30 = sshll.u32 %s114_s27, 4  ;;  %s117_s30 = int_to_ptr.hbm [resolvable:$true] %s116_s30 }
  0x14   : > { %s118_s29 = sshll.u32 %s107_s28, 4  ;;  %p327_p0 = pnand %p334_p13, %p553_p4  ;;  %s119_s29 = int_to_ptr.vmem [resolvable:$true] %s118_s29 }
  0x15   : > { %p312_p1 = scmp.ge.s32.totalorder %s500_s11, 1  ;;  %p123_p2 = scmp.lt.s32.totalorder %s500_s11, 3 }
  0x16   : > { %s104_s2 = scalar_lea.sflag [#allocation3], %s103_s22 }
  0x17   : > { %329 = dma.hbm_to_vmem [thread:$0]  (!%p327_p0), %s117_s30, 128, %s119_s29, %s104_s2  }
  0x18   : > { %p124_p3 = pnand %p312_p1, %p123_p2 }
  0x19   : > { %s586_s3 = sand.u32 (!%p124_p3), 1, %s484_s7  }
  0x1a   : > { %127 = sbr.rel (%p124_p3) target bundleno = 90 (0x5a), region = 24  ;;  %s313_s4 = sshll.u32 (!%p124_p3), %s586_s3, 3 }
  0x1b   : > { %s130_s5 = scalar_lea.sflag (!%p124_p3), [#allocation3], %s586_s3  ;;  %s133_s12 = scalar_lea.vmem (!%p124_p3), [#allocation2], %s313_s4 }
  0x1f   : > { %471 = dma.done.wait (%p559_p8), %s130_s5, 128  }
  0x20   : > { %473 = vsyncadd (%p559_p8), %s130_s5, 4294967168  ;;  %v155_v0 = vld [vmem:[%s133_s12] sm:$0xff]  ;;  %vm166_vm0 = vcmask 1043456   ;;  %s321_s13 = sshll.u32 %s492_s9, 3  ;;  %s152_s18 = scalar_lea.vmem [#allocation5], %s313_s4 }
  0x21   : > { %v156_v1 = vmul.f32 0.5, %v155_v0  ;;  %s216_s17 = scalar_lea.hbm %s640_s1, %s321_s13  ;;  %s218_s22 = sshll.u32 %s152_s18, 4  ;;  %s219_s22 = int_to_ptr.vmem [resolvable:$true] %s218_s22 }
  0x22   : > { %s220_s23 = sshll.u32 %s216_s17, 4  ;;  %s203_s9 = scalar_lea.sflag [#allocation4], %s586_s3  ;;  %s221_s23 = int_to_ptr.hbm [resolvable:$true] %s220_s23 }
  0x23   : > { %v157_v2 = vadd.f32 1.0, %v156_v1  ;;  %s432_s24 = sshra.s32 %s221_s23, 4  ;;  %s438_s28 = scalar_lea.hbm %s640_s1, 16  ;;  %s433_s24 = int_to_ptr.hbm [resolvable:$true] %s432_s24 }
  0x24   : > { %s434_s25 = scalar_lea.hbm %s433_s24, 8  ;;  %p439_p7 = scmp.lt.s32.totalorder %s433_s24, %s640_s1 }
  0x25   : > { %v158_v3 = vmul.f32 %v157_v2, %v155_v0  ;;  %p435_p4 = scmp.ne.s32.totalorder %s433_s24, %s434_s25  ;;  %p440_p8 = scmp.lt.s32.totalorder %s438_s28, %s434_s25 }
  0x27   : > { %v159_v4 = vadd.f32 1.0, %v158_v3  ;;  %p436_p5 = pnand %p435_p4, %p563_p9  ;;  %p441_p10 = por %p440_p8, %p439_p7 }
  0x29   : > { %161 = vst [vmem:[#allocation1] ss:$2 sm:$0xff] %v159_v4  ;;  %p437_p6 = pneg %p436_p5 }
  0x2b   : > { %p442_p13 = pnand %p441_p10, %p437_p6 }
  0x30   : > { %v162_v5 = vld.sshfl [vmem:[#allocation1] sm:$0xff pattern:$0x75316420]  ;;  %v163_v6 = vld.sshfl [vmem:[#allocation1 + $0x8] sm:$0xff pattern:$0x75316420] }
  0x31   : > { %v167_v7 = vsel %vm166_vm0, %v162_v5, 0.0  ;;  %v174_v8 = vsel %vm166_vm0, %v163_v6, 0.0 }
  0x32   : > { %v168_v9 = vrot.slane %v167_v7, 4  ;;  %v175_v10 = vrot.slane %v174_v8, 4 }
  0x34   : > { %v169_v11 = vadd.f32 %v168_v9, %v167_v7  ;;  %v176_v12 = vadd.f32 %v175_v10, %v174_v8 }
  0x36   : > { %v170_v13 = vrot.slane %v169_v11, 2  ;;  %v177_v14 = vrot.slane %v176_v12, 2 }
  0x38   : > { %v171_v15 = vadd.f32 %v170_v13, %v169_v11  ;;  %v178_v16 = vadd.f32 %v177_v14, %v176_v12 }
  0x3a   : > { %v172_v17 = vrot.slane %v171_v15, 1  ;;  %v179_v18 = vrot.slane %v178_v16, 1 }
  0x3c   : > { %v173_v19 = vadd.f32 %v172_v17, %v171_v15  ;;  %v180_v20 = vadd.f32 %v179_v18, %v178_v16 }
  0x3e   : > { %384 = vrcp.f32 %v173_v19 }
  0x3f   : > { %386 = vrcp.f32 %v180_v20 }
  0x44   : > { %v385_v21 = vpop.eup %384 }
  0x45   : > { %v387_v22 = vpop.eup %386  ;;  %v183_v23 = vmul.f32 %v385_v21, %v173_v19 }
  0x46   : > { %v184_v24 = vmul.f32 %v387_v22, %v180_v20 }
  0x47   : > { %v185_v25 = vsub.f32 2.0, %v183_v23 }
  0x48   : > { %v186_v26 = vsub.f32 2.0, %v184_v24 }
  0x49   : > { %v187_v27 = vmul.f32 %v385_v21, %v185_v25 }
  0x4a   : > { %v188_v28 = vmul.f32 %v387_v22, %v186_v26 }
  0x4b   : > { %v189_v29 = vmul.f32 %v187_v27, %v173_v19 }
  0x4c   : > { %v190_v30 = vmul.f32 %v188_v28, %v180_v20 }
  0x4d   : > { %v191_v31 = vsub.f32 2.0, %v189_v29 }
  0x4e   : > { %v192_v32 = vsub.f32 2.0, %v190_v30 }
  0x4f   : > { %v193_v34 = vmul.f32 %v191_v31, %v187_v27 }
  0x50   : > { %v194_v33 = vmul.f32 %v192_v32, %v188_v28 }
  0x52   : > { %v197_v35 = vrot.slane %v194_v33, 4 }
  0x54   : > { %v198_v36 = vsel %vm166_vm0, %v193_v34, %v197_v35 }
  0x55   : > { %v200_v37 = vmul.f32 %v198_v36, %v159_v4 }
  0x57   : > { %201 = vst [vmem:[%s152_s18] sm:$0xff] %v200_v37 }
  0x58   : > { %445 = shalt.err (!%p442_p13)
}
  0x59   : > { %324 = dma.vmem_to_hbm [thread:$0]  (%p563_p9), %s219_s22, 128, %s221_s23, %s203_s9  }
  0x5a PF: > { %s232_s2 = sand.u32 1, %s480_s6   ;;  %p331_p0 = pnand %p308_p12, %p570_p11 }
  0x5b   : > { %s233_s3 = scalar_lea.sflag [#allocation4], %s232_s2 }
  0x5c   : > { %p332_p1 = pneg %p331_p0 }
  0x5e   : > { %475 = dma.done.wait (%p332_p1), %s233_s3, 128  }
  0x5f   : > { %477 = vsyncadd (%p332_p1), %s233_s3, 4294967168  ;;  %s17_s11 = sadd.s32 1, %s500_s11   ;;  %s645_s6 = smov %s484_s7 }
  0x60   : > { %p14_p2 = scmp.ge.s32.totalorder %s17_s11, 4   ;;  %s646_s7 = smov %s488_s8 }
  0x61   : > { %s647_s8 = smov %s568_s20  ;;  %s648_s9 = smov %s496_s10 }
  0x62   : > { %s649_s10 = smov %s651_s14  ;;  %16 = sbr.rel (!%p14_p2) target bundleno = 6 (0x6), region = 69 }
  0x67   :  { %239 = vsyncpa [#allocation3], 1 }
  0x68   :  { %241 = vsyncpa [#allocation3 + $0x1], 1 }
  0x69   :  { %242 = vsyncpa [#allocation4], 1 }
  0x6a   :  { %244 = vsyncpa [#allocation4 + $0x1], 1 }

</bundles_post_ra>
